<compile_context>
chip_gen: v7x
topology: tpu7x:2x2x1
jax: 0.10.0
libtpu: 0.0.40
codegen_flags: <defaults>
</compile_context>

<pallas_src>
import jax
import jax.numpy as jnp
from jax.experimental import pallas as pl
from jax.experimental.pallas import tpu as pltpu

STATE_DIM = 4      # CartPole-v1 observation_space.shape = (4,)
ACTION_DIM = 2     # CartPole-v1 action_space.n = 2
HIDDEN = 128
PADDED_IN = 8      # obs features zero-padded to 8 so layer 1 is an MXU dot


def _round_up(x, m):
    return ((x + m - 1) // m) * m


def mlp_kernel(x_ref, w1_ref, w23_ref, w4_ref, b_ref, out_ref):
    # x_ref:   (TB, 8)   bf16  obs tile, features 4..7 are zero
    # w1_ref:  (8, 128)  bf16  layer-1 weight, rows >= STATE_DIM are zero
    # w23_ref: (2,128,128) bf16 layers 2 and 3 packed
    # w4_ref:  (128,128) bf16  layer-4 weight, cols >= ACTION_DIM are zero
    # b_ref:   (8, 128)  f32   rows 0..3 = b1,b2,b3,b4 (b4 zero-padded)
    # out_ref: (TB, 128) bf16  lane-dense output slab (cols >= 2 are padding)
    biases = b_ref[...]

    # ---- Layer 1: skinny-K MXU dot (K=8), f32 accumulate ----
    h = jnp.dot(x_ref[...], w1_ref[...],
                preferred_element_type=jnp.float32) + biases[0:1, :]
    h = jnp.maximum(h, 0.0).astype(jnp.bfloat16)

    # ---- Layers 2 & 3: dense 128x128 bf16 MXU matmuls, f32 accumulate ----
    h = jnp.dot(h, w23_ref[0],
                preferred_element_type=jnp.float32) + biases[1:2, :]
    h = jnp.maximum(h, 0.0).astype(jnp.bfloat16)
    h = jnp.dot(h, w23_ref[1],
                preferred_element_type=jnp.float32) + biases[2:3, :]
    h = jnp.maximum(h, 0.0).astype(jnp.bfloat16)

    # ---- Layer 4: lane-dense (128-wide, zero-padded) bf16 output store ----
    out = jnp.dot(h, w4_ref[...],
                  preferred_element_type=jnp.float32) + biases[3:4, :]
    out_ref[...] = out.astype(out_ref.dtype)


def pack_params(params):
    """Pack the 4 (W, b) pairs into 4 TPU-friendly arrays.

    Call this ONCE per parameter update (not per forward): it is hoisted out
    of the hot path on purpose.
    """
    (w1, b1), (w2, b2), (w3, b3), (w4, b4) = params
    bf = jnp.bfloat16
    w1p = jnp.zeros((PADDED_IN, HIDDEN), bf).at[:STATE_DIM, :].set(w1.astype(bf))
    w23 = jnp.stack([w2, w3], axis=0).astype(bf)                 # (2, 128, 128)
    w4p = jnp.zeros((HIDDEN, HIDDEN), bf).at[:, :ACTION_DIM].set(w4.astype(bf))
    b = jnp.zeros((8, HIDDEN), jnp.float32)
    b = b.at[0, :].set(b1.reshape(-1))
    b = b.at[1, :].set(b2.reshape(-1))
    b = b.at[2, :].set(b3.reshape(-1))
    b = b.at[3, :ACTION_DIM].set(b4.reshape(-1))
    return w1p, w23, w4p, b


def _choose_batch_tile(batch, batch_tile):
    align = 16  # bf16 sublane packing
    if batch >= 256:
        # Force >= 2 grid steps so the 'parallel' batch axis is shardable
        # across both v7x TensorCores; on single-TC chips the extra step
        # costs ~0.35us, negligible at this batch size.
        tb = _round_up(-(-batch // 2), align)
    else:
        tb = _round_up(batch, align)
    tb = min(tb, batch_tile)
    return _round_up(max(tb, align), align)


def net_forward(obs, packed_params, *, batch_tile=8192):
    """Equivalent of Net.forward(obs)[0] (logits).  `packed_params` comes from
    pack_params(); the `state` passthrough is handled by the caller."""
    w1p, w23, w4p, b = packed_params

    batch = obs.shape[0]
    x = obs.reshape(batch, -1).astype(jnp.bfloat16)      # obs.view(batch, -1)

    tb = _choose_batch_tile(batch, batch_tile)
    b_pad = _round_up(batch, tb)
    pad_rows = b_pad - batch
    pad_cols = PADDED_IN - x.shape[1]
    if pad_rows or pad_cols:                              # fuses under jit
        x = jnp.pad(x, ((0, pad_rows), (0, pad_cols)))
    grid = (b_pad // tb,)

    flops = 2 * b_pad * (PADDED_IN * HIDDEN + 3 * HIDDEN * HIDDEN)
    bytes_accessed = (
        x.size * x.dtype.itemsize
        + sum(a.size * a.dtype.itemsize for a in (w1p, w23, w4p, b))
        + b_pad * HIDDEN * 2)                             # bf16 output slab

    out = pl.pallas_call(
        mlp_kernel,
        out_shape=jax.ShapeDtypeStruct((b_pad, HIDDEN), jnp.bfloat16),
        grid=grid,
        in_specs=[
            pl.BlockSpec((tb, PADDED_IN), lambda i: (i, 0)),          # x tile
            pl.BlockSpec((PADDED_IN, HIDDEN), lambda i: (0, 0)),      # w1 (resident)
            pl.BlockSpec((2, HIDDEN, HIDDEN), lambda i: (0, 0, 0)),   # w2/w3 (resident)
            pl.BlockSpec((HIDDEN, HIDDEN), lambda i: (0, 0)),         # w4 padded (resident)
            pl.BlockSpec((8, HIDDEN), lambda i: (0, 0)),              # biases (resident)
        ],
        out_specs=pl.BlockSpec((tb, HIDDEN), lambda i: (i, 0)),
        compiler_params=pltpu.CompilerParams(
            dimension_semantics=("parallel",),            # shard batch across TCs
        ),
        cost_estimate=pl.CostEstimate(
            flops=flops, transcendentals=0, bytes_accessed=bytes_accessed),
    )(x, w1p, w23, w4p, b)

    return out[:batch, :ACTION_DIM].astype(jnp.float32)


def init_params(key):
    """Deterministic init matching the PyTorch layer shapes.
    PyTorch Linear weight is (out, in); we store the transpose (in, out)."""
    dims = [(STATE_DIM, HIDDEN), (HIDDEN, HIDDEN), (HIDDEN, HIDDEN), (HIDDEN, ACTION_DIM)]
    params = []
    for i, (fan_in, fan_out) in enumerate(dims):
        kw, kb, key = jax.random.split(jax.random.fold_in(key, i), 3)
        bound = 1.0 / jnp.sqrt(fan_in)                    # PyTorch default uniform bound
        w = jax.random.uniform(kw, (fan_in, fan_out), jnp.float32, -bound, bound)
        b = jax.random.uniform(kb, (1, fan_out), jnp.float32, -bound, bound)
        params.append((w, b))
    return params


def reference_forward_bf16(obs, params):
    """Mirrors the kernel arithmetic: bf16 dot operands, f32 accumulate."""
    bf = jnp.bfloat16
    x = obs.reshape(obs.shape[0], -1).astype(bf)
    (w1, b1), (w2, b2), (w3, b3), (w4, b4) = params
    h = jnp.dot(x, w1.astype(bf), preferred_element_type=jnp.float32) + b1
    h = jnp.maximum(h, 0.0).astype(bf)
    h = jnp.dot(h, w2.astype(bf), preferred_element_type=jnp.float32) + b2
    h = jnp.maximum(h, 0.0).astype(bf)
    h = jnp.dot(h, w3.astype(bf), preferred_element_type=jnp.float32) + b3
    h = jnp.maximum(h, 0.0).astype(bf)
    return jnp.dot(h, w4.astype(bf), preferred_element_type=jnp.float32) + b4


def reference_forward_f32(obs, params):
    x = obs.reshape(obs.shape[0], -1).astype(jnp.float32)
    (w1, b1), (w2, b2), (w3, b3), (w4, b4) = params
    h = jnp.maximum(x @ w1 + b1, 0.0)
    h = jnp.maximum(h @ w2 + b2, 0.0)
    h = jnp.maximum(h @ w3 + b3, 0.0)
    return h @ w4 + b4


if __name__ == "__main__":
    key = jax.random.PRNGKey(0)
    params = init_params(key)
    packed = pack_params(params)          # packed ONCE, reused for all forwards
    packed = jax.block_until_ready(packed)

    fwd = jax.jit(net_forward, static_argnames=("batch_tile",))

    # Small single-tile case (batch=8): latency / action-selection path.
    batch = 8
    obs = jax.random.normal(jax.random.fold_in(key, 123), (batch, STATE_DIM), jnp.float32)
    logits = fwd(obs, packed)
    state = None  # Net.forward returns (logits, state); state passes through unchanged
    jax.block_until_ready(logits)
    assert logits.shape == (batch, ACTION_DIM)
    ref_bf = reference_forward_bf16(obs, params)
    ref_f32 = reference_forward_f32(obs, params)
    assert jnp.allclose(logits, ref_bf, atol=2e-2, rtol=2e-2)
    assert jnp.allclose(logits, ref_f32, atol=6e-2, rtol=6e-2)

    # Larger ragged batch: exercises the >=2-step grid + pad/slice path.
    batch2 = 300
    obs2 = jax.random.normal(jax.random.fold_in(key, 456), (batch2, STATE_DIM), jnp.float32)
    logits2 = fwd(obs2, packed)
    jax.block_until_ready(logits2)
    assert logits2.shape == (batch2, ACTION_DIM)
    ref2_bf = reference_forward_bf16(obs2, params)
    ref2_f32 = reference_forward_f32(obs2, params)
    assert jnp.allclose(logits2, ref2_bf, atol=2e-2, rtol=2e-2)
    assert jnp.allclose(logits2, ref2_f32, atol=6e-2, rtol=6e-2)

    print("KERNEL_OK")
</pallas_src>

<mosaic_0001>
module attributes {stable_mosaic.version = 11 : i64} {
  func.func @mlp_kernel(%arg0: i32, %arg1: memref<16x8xbf16, #tpu.memory_space<vmem>>, %arg2: memref<8x128xbf16, #tpu.memory_space<vmem>>, %arg3: memref<2x128x128xbf16, #tpu.memory_space<vmem>>, %arg4: memref<128x128xbf16, #tpu.memory_space<vmem>>, %arg5: memref<8x128xf32, #tpu.memory_space<vmem>>, %arg6: memref<16x128xbf16, #tpu.memory_space<vmem>>) attributes {dimension_semantics = [#tpu.dimension_semantics<parallel>], iteration_bounds = array<i64: 1>, scalar_prefetch = 0 : i64, scratch_operands = 0 : i64, tpu.core_type = #tpu.core_type<tc>, window_params = [{transform_indices = @transform_0, window_bounds = array<i64: 16, 8>}, {pipeline_mode = #tpu.pipeline_mode<synchronous>, transform_indices = @transform_1, window_bounds = array<i64: 8, 128>}, {pipeline_mode = #tpu.pipeline_mode<synchronous>, transform_indices = @transform_2, window_bounds = array<i64: 2, 128, 128>}, {pipeline_mode = #tpu.pipeline_mode<synchronous>, transform_indices = @transform_3, window_bounds = array<i64: 128, 128>}, {pipeline_mode = #tpu.pipeline_mode<synchronous>, transform_indices = @transform_4, window_bounds = array<i64: 8, 128>}, {transform_indices = @transform_5, window_bounds = array<i64: 16, 128>}]} {
    %c0 = arith.constant 0 : index
    %c0_0 = arith.constant 0 : index
    %0 = vector.load %arg5[%c0, %c0_0] : memref<8x128xf32, #tpu.memory_space<vmem>>, vector<8x128xf32>
    %c0_1 = arith.constant 0 : index
    %c0_2 = arith.constant 0 : index
    %1 = vector.load %arg1[%c0_1, %c0_2] : memref<16x8xbf16, #tpu.memory_space<vmem>>, vector<16x8xbf16>
    %c0_3 = arith.constant 0 : index
    %c0_4 = arith.constant 0 : index
    %2 = vector.load %arg2[%c0_3, %c0_4] : memref<8x128xbf16, #tpu.memory_space<vmem>>, vector<8x128xbf16>
    %cst = arith.constant dense<0.000000e+00> : vector<16x128xf32>
    %3 = tpu.matmul %1, %2, %cst {dimension_numbers = #tpu.dot_dimension_numbers<[1], [0], [0], [1], [0, 0, 1, 1], [], []>} : vector<16x8xbf16>, vector<8x128xbf16>, vector<16x128xf32> -> vector<16x128xf32>
    %4 = vector.extract_strided_slice %0 {offsets = [0, 0], sizes = [1, 128], strides = [1, 1]} : vector<8x128xf32> to vector<1x128xf32>
    %5 = vector.broadcast %4 : vector<1x128xf32> to vector<16x128xf32>
    %6 = arith.addf %3, %5 : vector<16x128xf32>
    %cst_5 = arith.constant 0.000000e+00 : f32
    %7 = vector.broadcast %cst_5 : f32 to vector<16x128xf32>
    %8 = arith.maximumf %6, %7 : vector<16x128xf32>
    %9 = arith.truncf %8 : vector<16x128xf32> to vector<16x128xbf16>
    %c0_6 = arith.constant 0 : index
    %c0_7 = arith.constant 0 : index
    %c0_8 = arith.constant 0 : index
    %10 = vector.load %arg3[%c0_6, %c0_7, %c0_8] : memref<2x128x128xbf16, #tpu.memory_space<vmem>>, vector<1x128x128xbf16>
    %11 = vector.shape_cast %10 : vector<1x128x128xbf16> to vector<128x128xbf16>
    %cst_9 = arith.constant dense<0.000000e+00> : vector<16x128xf32>
    %12 = tpu.matmul %9, %11, %cst_9 {dimension_numbers = #tpu.dot_dimension_numbers<[1], [0], [0], [1], [0, 0, 1, 1], [], []>} : vector<16x128xbf16>, vector<128x128xbf16>, vector<16x128xf32> -> vector<16x128xf32>
    %13 = vector.extract_strided_slice %0 {offsets = [1, 0], sizes = [1, 128], strides = [1, 1]} : vector<8x128xf32> to vector<1x128xf32>
    %14 = vector.broadcast %13 : vector<1x128xf32> to vector<16x128xf32>
    %15 = arith.addf %12, %14 : vector<16x128xf32>
    %cst_10 = arith.constant 0.000000e+00 : f32
    %16 = vector.broadcast %cst_10 : f32 to vector<16x128xf32>
    %17 = arith.maximumf %15, %16 : vector<16x128xf32>
    %18 = arith.truncf %17 : vector<16x128xf32> to vector<16x128xbf16>
    %c1 = arith.constant 1 : index
    %c0_11 = arith.constant 0 : index
    %c0_12 = arith.constant 0 : index
    %19 = vector.load %arg3[%c1, %c0_11, %c0_12] : memref<2x128x128xbf16, #tpu.memory_space<vmem>>, vector<1x128x128xbf16>
    %20 = vector.shape_cast %19 : vector<1x128x128xbf16> to vector<128x128xbf16>
    %cst_13 = arith.constant dense<0.000000e+00> : vector<16x128xf32>
    %21 = tpu.matmul %18, %20, %cst_13 {dimension_numbers = #tpu.dot_dimension_numbers<[1], [0], [0], [1], [0, 0, 1, 1], [], []>} : vector<16x128xbf16>, vector<128x128xbf16>, vector<16x128xf32> -> vector<16x128xf32>
    %22 = vector.extract_strided_slice %0 {offsets = [2, 0], sizes = [1, 128], strides = [1, 1]} : vector<8x128xf32> to vector<1x128xf32>
    %23 = vector.broadcast %22 : vector<1x128xf32> to vector<16x128xf32>
    %24 = arith.addf %21, %23 : vector<16x128xf32>
    %cst_14 = arith.constant 0.000000e+00 : f32
    %25 = vector.broadcast %cst_14 : f32 to vector<16x128xf32>
    %26 = arith.maximumf %24, %25 : vector<16x128xf32>
    %27 = arith.truncf %26 : vector<16x128xf32> to vector<16x128xbf16>
    %c0_15 = arith.constant 0 : index
    %c0_16 = arith.constant 0 : index
    %28 = vector.load %arg4[%c0_15, %c0_16] : memref<128x128xbf16, #tpu.memory_space<vmem>>, vector<128x128xbf16>
    %cst_17 = arith.constant dense<0.000000e+00> : vector<16x128xf32>
    %29 = tpu.matmul %27, %28, %cst_17 {dimension_numbers = #tpu.dot_dimension_numbers<[1], [0], [0], [1], [0, 0, 1, 1], [], []>} : vector<16x128xbf16>, vector<128x128xbf16>, vector<16x128xf32> -> vector<16x128xf32>
    %30 = vector.extract_strided_slice %0 {offsets = [3, 0], sizes = [1, 128], strides = [1, 1]} : vector<8x128xf32> to vector<1x128xf32>
    %31 = vector.broadcast %30 : vector<1x128xf32> to vector<16x128xf32>
    %32 = arith.addf %29, %31 : vector<16x128xf32>
    %33 = arith.truncf %32 : vector<16x128xf32> to vector<16x128xbf16>
    %c0_18 = arith.constant 0 : index
    %c0_19 = arith.constant 0 : index
    %34 = vector.load %arg6[%c0_18, %c0_19] : memref<16x128xbf16, #tpu.memory_space<vmem>>, vector<16x128xbf16>
    tpu.vector_store %arg6[%c0_18, %c0_19], %33 {strides = array<i32>} : memref<16x128xbf16, #tpu.memory_space<vmem>>, vector<16x128xbf16>,
    return
  }
  func.func @transform_0(%arg0: i32) -> (i32, i32) {
    %c0_i32 = arith.constant 0 : i32
    %c0_i32_0 = arith.constant 0 : i32
    return %arg0, %c0_i32 : i32, i32
  }
  func.func @transform_1(%arg0: i32) -> (i32, i32) {
    %c0_i32 = arith.constant 0 : i32
    %c0_i32_0 = arith.constant 0 : i32
    %c0_i32_1 = arith.constant 0 : i32
    return %c0_i32, %c0_i32_0 : i32, i32
  }
  func.func @transform_2(%arg0: i32) -> (i32, i32, i32) {
    %c0_i32 = arith.constant 0 : i32
    %c0_i32_0 = arith.constant 0 : i32
    %c0_i32_1 = arith.constant 0 : i32
    %c0_i32_2 = arith.constant 0 : i32
    return %c0_i32, %c0_i32_0, %c0_i32_1 : i32, i32, i32
  }
  func.func @transform_3(%arg0: i32) -> (i32, i32) {
    %c0_i32 = arith.constant 0 : i32
    %c0_i32_0 = arith.constant 0 : i32
    %c0_i32_1 = arith.constant 0 : i32
    return %c0_i32, %c0_i32_0 : i32, i32
  }
  func.func @transform_4(%arg0: i32) -> (i32, i32) {
    %c0_i32 = arith.constant 0 : i32
    %c0_i32_0 = arith.constant 0 : i32
    %c0_i32_1 = arith.constant 0 : i32
    return %c0_i32, %c0_i32_0 : i32, i32
  }
  func.func @transform_5(%arg0: i32) -> (i32, i32) {
    %c0_i32 = arith.constant 0 : i32
    %c0_i32_0 = arith.constant 0 : i32
    return %arg0, %c0_i32 : i32, i32
  }
}

</mosaic_0001>

<bundles_post_ra>
// kernel: net_forward.1
= control target key start
LH: loop header
LB: loop body
LE: loop exit
PB: predicated region body
PF: predicated region fallthrough
CT: control target
= control target key end

     0   :  { %10 = vsyncpa [#allocation3], 0  ;;  %s790_s0 = inlined_call_operand.vmem [shape: bf16[16,8], index: 0, kind: input, shape index: {}]   ;;  %s791_s1 = inlined_call_operand.vmem [shape: bf16[8,128], index: 1, kind: input, shape index: {}]   ;;  %s792_s2 = inlined_call_operand.hbm [shape: bf16[2,128,128], index: 2, kind: input, shape index: {}]   ;;  %s793_s3 = inlined_call_operand.hbm [shape: bf16[128,128], index: 3, kind: input, shape index: {}]   ;;  %s794_s4 = inlined_call_operand.vmem [shape: f32[8,128], index: 4, kind: input, shape index: {}]   ;;  %s795_s5 = inlined_call_operand.vmem [shape: bf16[16,128], index: 5, kind: output, shape index: {}]  }
   0x1   :  { %11 = vsyncpa [#allocation5], 0  ;;  %s673_s18 = smov [#allocation2]   ;;  %s625_s22 = scalar_lea.hbm %s792_s2, 2048 }
   0x2   :  { %s21_s19 = sshll.u32 %s673_s18, 4  ;;  %p626_p0 = scmp.ne.s32.totalorder %s792_s2, %s625_s22  ;;  %s22_s19 = int_to_ptr.vmem [resolvable:$true] %s21_s19 }
   0x3   :  { %p629_p1 = scmp.lt.u32.totalorder %s625_s22, %s792_s2 }
   0x5   :  { %p631_p2 = pnand %p629_p1, %p626_p0 }
   0x7   :  { %634 = shalt.err (!%p631_p2)
}
   0x8   :  { %s635_s27 = scalar_lea.vmem %s22_s19, 2048  ;;  %p640_p4 = scmp.lt.s32.totalorder %s22_s19, %s22_s19 }
   0x9   :  { %p636_p3 = scmp.ne.s32.totalorder %s22_s19, %s635_s27  ;;  %p641_p5 = scmp.lt.s32.totalorder %s635_s27, %s635_s27 }
   0xb   :  { %p642_p6 = por %p641_p5, %p640_p4 }
   0xd   :  { %p643_p7 = pnand %p642_p6, %p636_p3 }
   0xf   :  { %646 = shalt.err (!%p643_p7)
}
  0x10   :  { %s674_s28 = smov 64   ;;  %s675_s29 = smov 4  }
  0x11   :  { %27 = dma.hbm_to_vmem [thread:$0]  %s792_s2, 2048, %s22_s19, [#allocation3], %s674_s28, %s674_s28, %s675_s29  }
  0x12   :  { %s676_s7 = smov [#allocation4]   ;;  %s647_s11 = scalar_lea.hbm %s793_s3, 1024 }
  0x13   :  { %s33_s8 = sshll.u32 %s676_s7, 4  ;;  %p648_p8 = scmp.ne.s32.totalorder %s793_s3, %s647_s11  ;;  %s34_s8 = int_to_ptr.vmem [resolvable:$true] %s33_s8 }
  0x14   :  { %p651_p9 = scmp.lt.u32.totalorder %s647_s11, %s793_s3 }
  0x16   :  { %p653_p10 = pnand %p651_p9, %p648_p8 }
  0x18   :  { %656 = shalt.err (!%p653_p10)
}
  0x19   :  { %s657_s16 = scalar_lea.vmem %s34_s8, 1024  ;;  %p662_p12 = scmp.lt.s32.totalorder %s34_s8, %s34_s8 }
  0x1a   :  { %p658_p11 = scmp.ne.s32.totalorder %s34_s8, %s657_s16  ;;  %p663_p13 = scmp.lt.s32.totalorder %s657_s16, %s657_s16 }
  0x1c   :  { %p664_p0 = por %p663_p13, %p662_p12 }
  0x1e   :  { %p665_p1 = pnand %p664_p0, %p658_p11 }
  0x20   :  { %668 = shalt.err (!%p665_p1)
}
  0x21   :  { %39 = dma.hbm_to_vmem [thread:$0]  %s793_s3, 1024, %s34_s8, [#allocation5], %s674_s28, %s674_s28, %s675_s29  }
  0x22   :  { %669 = dma.done.wait [#allocation3], 2048  }
  0x23   :  { %670 = vsyncadd [#allocation3], 4294965248 }
  0x24   :  { %671 = dma.done.wait [#allocation5], 1024  }
  0x25   :  { %672 = vsyncadd [#allocation5], 4294966272  ;;  %v677_v0 = vmov 0.0   ;;  %vm678_vm0 = vmmov 0   ;;  %vm66_vm1 = vcmask 1043456   ;;  %v600_v3 = vld [vmem:[%s790_s0] sm:$0xff]   ;;  %v53_v18 = vlaneseq }
  0x26   :  { %528 = vmatprep.subr.bf16.mxu0 %v677_v0  ;;  %530 = vmatprep.mubr.msk.bf16.mxu0 %vm678_vm0, %v677_v0  ;;  %v52_v1 = vld [vmem:[%s791_s1] sm:$0xf]  ;;  %vm62_vm2 = vcmask 64512   ;;  %v602_v5 = vld [vmem:[#allocation2 + $0x8] sm:$0xff]   ;;  %v603_v6 = vld [vmem:[#allocation2 + $0x10] sm:$0xff]  }
  0x27   :  { %534 = vmatprep.subr.bf16.mxu1 %v677_v0  ;;  %550 = vmatprep.mubr.msk.bf16.mxu1 %vm678_vm0, %v677_v0  ;;  %v68_v2 = vsel %vm66_vm1, %v52_v1, 0  ;;  %v601_v4 = vld [vmem:[#allocation2] sm:$0xff]   ;;  %v604_v7 = vld [vmem:[#allocation2 + $0x18] sm:$0xff]   ;;  %v606_v9 = vld [vmem:[#allocation2 + $0x28] sm:$0xff]   ;;  %v762_v19 = vshrl.u32 %v53_v18, 7 }
  0x28   :  { %529 = vmatpush3.bf16.msra.mxu0 %v68_v2  ;;  %535 = vmatpush3.bf16.msra.mxu1 %v601_v4  ;;  %v605_v8 = vld [vmem:[#allocation2 + $0x20] sm:$0xff]   ;;  %v607_v10 = vld [vmem:[#allocation2 + $0x30] sm:$0xff]   ;;  %v608_v11 = vld [vmem:[#allocation2 + $0x38] sm:$0xff]  }
  0x29   :  { %554 = vmatprep.subr.bf16.mxu0 %v677_v0  ;;  %536 = vmatprep.subr.bf16.mxu1 %v677_v0  ;;  %v609_v12 = vld [vmem:[#allocation2 + $0x40] sm:$0xff]   ;;  %v610_v13 = vld [vmem:[#allocation2 + $0x48] sm:$0xff]   ;;  %v611_v14 = vld [vmem:[#allocation2 + $0x50] sm:$0xff]   ;;  %v55_v20 = vsub.s32 0, %v762_v19  ;;  %v132_v40 = vsub.s32 1, %v762_v19  ;;  %v245_v53 = vsub.s32 2, %v762_v19 }
  0x2a   :  { %v612_v15 = vld [vmem:[#allocation2 + $0x58] sm:$0xff]   ;;  %v613_v16 = vld [vmem:[#allocation2 + $0x60] sm:$0xff]   ;;  %v614_v17 = vld [vmem:[#allocation2 + $0x68] sm:$0xff]   ;;  %v357_v1 = vsub.s32 3, %v762_v19 }
  0x2b   :  { %531 = vmatmul.mubr.msk.bf16.vlgmr.msra.gmra.mrb[0].mxu0 %vm62_vm2, %v600_v3  ;;  %v768_v21 = vld [vmem:[%s794_s4] sm:$0xff]  ;;  %v615_v32 = vld [vmem:[#allocation2 + $0x70] sm:$0xff]   ;;  %v616_v33 = vld [vmem:[#allocation2 + $0x78] sm:$0xff]  }
  0x2c   :  { %570 = vmatprep.mubr.msk.bf16.mxu0 %vm678_vm0, %v677_v0  ;;  %537 = vmatpush3.bf16.msra.mxu1 %v602_v5  ;;  %v56_v22 = vrot.slane %v768_v21, %v55_v20  ;;  %v617_v34 = vld [vmem:[#allocation4] sm:$0xff]   ;;  %v618_v35 = vld [vmem:[#allocation4 + $0x8] sm:$0xff]   ;;  %v619_v36 = vld [vmem:[#allocation4 + $0x10] sm:$0xff]   ;;  %v133_v41 = vrot.slane %v768_v21, %v132_v40  ;;  %v246_v54 = vrot.slane %v768_v21, %v245_v53 }
  0x2d   :  { %538 = vmatprep.subr.bf16.mxu1 %v677_v0  ;;  %555 = vmatpush3.bf16.msra.mxu0 %v609_v12  ;;  %v620_v37 = vld [vmem:[#allocation4 + $0x18] sm:$0xff]   ;;  %v621_v38 = vld [vmem:[#allocation4 + $0x20] sm:$0xff]   ;;  %v622_v39 = vld [vmem:[#allocation4 + $0x28] sm:$0xff]  }
  0x2e   :  { %556 = vmatprep.subr.bf16.mxu0 %v677_v0  ;;  %v623_v51 = vld [vmem:[#allocation4 + $0x30] sm:$0xff]   ;;  %v624_v52 = vld [vmem:[#allocation4 + $0x38] sm:$0xff]  }
  0x30   :  { %539 = vmatpush3.bf16.msra.mxu1 %v603_v6 }
  0x31   :  { %540 = vmatprep.subr.bf16.mxu1 %v677_v0  ;;  %557 = vmatpush3.bf16.msra.mxu0 %v610_v13 }
  0x32   :  { %558 = vmatprep.subr.bf16.mxu0 %v677_v0 }
  0x34   :  { %541 = vmatpush3.bf16.msra.mxu1 %v604_v7 }
  0x35   :  { %542 = vmatprep.subr.bf16.mxu1 %v677_v0  ;;  %559 = vmatpush3.bf16.msra.mxu0 %v611_v14 }
  0x36   :  { %560 = vmatprep.subr.bf16.mxu0 %v677_v0 }
  0x38   :  { %543 = vmatpush3.bf16.msra.mxu1 %v605_v8 }
  0x39   :  { %544 = vmatprep.subr.bf16.mxu1 %v677_v0  ;;  %561 = vmatpush3.bf16.msra.mxu0 %v612_v15 }
  0x3a   :  { %562 = vmatprep.subr.bf16.mxu0 %v677_v0 }
  0x3c   :  { %545 = vmatpush3.bf16.msra.mxu1 %v606_v9 }
  0x3d   :  { %546 = vmatprep.subr.bf16.mxu1 %v677_v0  ;;  %563 = vmatpush3.bf16.msra.mxu0 %v613_v16 }
  0x3e   :  { %564 = vmatprep.subr.bf16.mxu0 %v677_v0 }
  0x40   :  { %547 = vmatpush3.bf16.msra.mxu1 %v607_v10 }
  0x41   :  { %548 = vmatprep.subr.bf16.mxu1 %v677_v0  ;;  %565 = vmatpush3.bf16.msra.mxu0 %v614_v17 }
  0x42   :  { %566 = vmatprep.subr.bf16.mxu0 %v677_v0 }
  0x44   :  { %549 = vmatpush3.bf16.msra.mxu1 %v608_v11 }
  0x45   :  { %574 = vmatprep.subr.bf16.mxu1 %v677_v0  ;;  %567 = vmatpush3.bf16.msra.mxu0 %v615_v32 }
  0x46   :  { %568 = vmatprep.subr.bf16.mxu0 %v677_v0 }
  0x49   :  { %569 = vmatpush3.bf16.msra.mxu0 %v616_v33 }
  0xfe   :  { %v104_v23 = vpop.f32.mrb[0].mxu0 }
  0xff   :  { %v105_v24 = vadd.f32 %v104_v23, %v56_v22  ;;  %v532_v25 = vpop.f32.mrb[1].mxu0 }
 0x100   :  { %v107_v26 = vpop.f32.mrb[2].mxu0 }
 0x101   :  { %v108_v27 = vadd.f32 %v107_v26, %v56_v22  ;;  %v533_v28 = vpop.f32.mrb[3].mxu0  ;;  %v111_v29 = vmax.f32 %v105_v24, 0.0 }
 0x103   :  { %v112_v30 = vmax.f32 %v108_v27, 0.0 }
 0x105   :  { %v113_v31 = vpack.c.bf16 %v112_v30, %v111_v29 }
 0x107   :  { %551 = vmatmul.mubr.bf16.vlgmr.msra.gmra.mrb[0].mxu1 %v113_v31 }
 0x108   :  { %590 = vmatprep.mubr.msk.bf16.mxu1 %vm678_vm0, %v677_v0  ;;  %575 = vmatpush3.bf16.msra.mxu1 %v617_v34 }
 0x109   :  { %576 = vmatprep.subr.bf16.mxu1 %v677_v0 }
 0x10c   :  { %577 = vmatpush3.bf16.msra.mxu1 %v618_v35 }
 0x10d   :  { %578 = vmatprep.subr.bf16.mxu1 %v677_v0 }
 0x110   :  { %579 = vmatpush3.bf16.msra.mxu1 %v619_v36 }
 0x111   :  { %580 = vmatprep.subr.bf16.mxu1 %v677_v0 }
 0x114   :  { %581 = vmatpush3.bf16.msra.mxu1 %v620_v37 }
 0x115   :  { %582 = vmatprep.subr.bf16.mxu1 %v677_v0 }
 0x118   :  { %583 = vmatpush3.bf16.msra.mxu1 %v621_v38 }
 0x119   :  { %584 = vmatprep.subr.bf16.mxu1 %v677_v0 }
 0x11c   :  { %585 = vmatpush3.bf16.msra.mxu1 %v622_v39 }
 0x11d   :  { %586 = vmatprep.subr.bf16.mxu1 %v677_v0 }
 0x120   :  { %587 = vmatpush3.bf16.msra.mxu1 %v623_v51 }
 0x121   :  { %588 = vmatprep.subr.bf16.mxu1 %v677_v0  ;;  %v358_v0 = vrot.slane %v768_v21, %v357_v1 }
 0x124   :  { %589 = vmatpush3.bf16.msra.mxu1 %v624_v52 }
 0x1da   :  { %v216_v42 = vpop.f32.mrb[0].mxu1 }
 0x1db   :  { %v217_v43 = vadd.f32 %v216_v42, %v133_v41  ;;  %v552_v44 = vpop.f32.mrb[1].mxu1 }
 0x1dc   :  { %v219_v45 = vpop.f32.mrb[2].mxu1 }
 0x1dd   :  { %v220_v46 = vadd.f32 %v219_v45, %v133_v41  ;;  %v553_v47 = vpop.f32.mrb[3].mxu1  ;;  %v223_v48 = vmax.f32 %v217_v43, 0.0 }
 0x1df   :  { %v224_v49 = vmax.f32 %v220_v46, 0.0 }
 0x1e1   :  { %v225_v50 = vpack.c.bf16 %v224_v49, %v223_v48 }
 0x1e3   :  { %571 = vmatmul.mubr.bf16.vlgmr.msra.gmra.mrb[4].mxu0 %v225_v50 }
 0x2b6   :  { %v329_v55 = vpop.f32.mrb[4].mxu0 }
 0x2b7   :  { %v330_v56 = vadd.f32 %v329_v55, %v246_v54  ;;  %v572_v57 = vpop.f32.mrb[5].mxu0 }
 0x2b8   :  { %v332_v58 = vpop.f32.mrb[6].mxu0 }
 0x2b9   :  { %v333_v59 = vadd.f32 %v332_v58, %v246_v54  ;;  %v573_v60 = vpop.f32.mrb[7].mxu0  ;;  %v336_v61 = vmax.f32 %v330_v56, 0.0 }
 0x2bb   :  { %v337_v62 = vmax.f32 %v333_v59, 0.0 }
 0x2bd   :  { %v338_v63 = vpack.c.bf16 %v337_v62, %v336_v61 }
 0x2bf   :  { %591 = vmatmul.mubr.bf16.vlgmr.msra.gmra.mrb[4].mxu1 %v338_v63 }
 0x392   :  { %v441_v2 = vpop.f32.mrb[4].mxu1 }
 0x393   :  { %v592_v3 = vpop.f32.mrb[5].mxu1  ;;  %v442_v5 = vadd.f32 %v441_v2, %v358_v0 }
 0x394   :  { %v444_v4 = vpop.f32.mrb[6].mxu1 }
 0x395   :  { %v445_v6 = vadd.f32 %v444_v4, %v358_v0  ;;  %v593_v7 = vpop.f32.mrb[7].mxu1 }
 0x397   :  { %v497_v8 = vpack.c.bf16 %v445_v6, %v442_v5 }
 0x399   :  { %498 = vst [vmem:[%s795_s5] sm:$0xff] %v497_v8  }
 0x39a   :  { %462 = vsyncpa [#allocation3], 1 }
 0x39b   :  { %463 = vsyncpa [#allocation5], 1 }

</bundles_post_ra>
